<compile_context>
chip_gen: v7x
topology: tpu7x:2x2x1
jax: 0.10.0
libtpu: 0.0.40
codegen_flags: <defaults>
</compile_context>

<pallas_src>
import math
from functools import partial

import numpy as np
import jax
import jax.numpy as jnp
from jax.experimental import pallas as pl
from jax.experimental.pallas import tpu as pltpu

LANE = 128


def _round_up(x, m):
    return ((x + m - 1) // m) * m


# ----------------------------------------------------------------------------
# Host-side (numpy) construction of the wigner_d_info constants
# ----------------------------------------------------------------------------
def _wigner_small_d(l, beta):
    """Complex-basis Wigner small-d matrix d^l_{m'm}(beta), m ordered -l..l."""
    d = np.zeros((2 * l + 1, 2 * l + 1))
    for i, mp in enumerate(range(-l, l + 1)):
        for j, m in enumerate(range(-l, l + 1)):
            pref = math.sqrt(
                math.factorial(l + mp) * math.factorial(l - mp)
                * math.factorial(l + m) * math.factorial(l - m))
            smin = max(0, m - mp)
            smax = min(l + m, l - mp)
            tot = 0.0
            for s in range(smin, smax + 1):
                num = (-1.0) ** (mp - m + s)
                den = (math.factorial(l + m - s) * math.factorial(s)
                       * math.factorial(mp - m + s) * math.factorial(l - mp - s))
                tot += (num / den) * math.cos(beta / 2) ** (2 * l + m - mp - 2 * s) \
                       * math.sin(beta / 2) ** (mp - m + 2 * s)
            d[i, j] = pref * tot
    return d


def _complex_to_real(l):
    """Unitary change of basis complex SH -> real SH."""
    C = np.zeros((2 * l + 1, 2 * l + 1), dtype=complex)
    for m in range(-l, l + 1):
        i = m + l
        if m > 0:
            C[i, -m + l] = 1.0 / np.sqrt(2)
            C[i, m + l] = (-1.0) ** m / np.sqrt(2)
        elif m == 0:
            C[i, l] = 1.0
        else:
            am = -m
            C[i, -am + l] = 1j / np.sqrt(2)
            C[i, am + l] = -1j * (-1.0) ** am / np.sqrt(2)
    return C


def _real_j_block(l):
    """Real-basis J matrix for degree l: Wigner D of the involution swapping y<->z."""
    if l == 0:
        return np.ones((1, 1))
    a = b = g = math.pi / 2
    d = _wigner_small_d(l, b)
    ms = np.arange(-l, l + 1)
    Dc = np.exp(-1j * ms[:, None] * a) * d * np.exp(-1j * ms[None, :] * g)
    C = _complex_to_real(l)
    Jr = C @ Dc @ C.conj().T
    assert np.max(np.abs(Jr.imag)) < 1e-8
    Jr = np.real(Jr)
    assert np.allclose(Jr @ Jr, np.eye(2 * l + 1), atol=1e-8)       # involution
    assert np.allclose(Jr @ Jr.T, np.eye(2 * l + 1), atol=1e-8)     # orthogonal
    return Jr


def build_wigner_d_info(irreps):
    """irreps: list of (multiplicity, l).  Parity is irrelevant for rotations."""
    max_m = max((l for _, l in irreps), default=0)
    m_vals, partner, j_blocks = [], [], []
    offset = 0
    for mul, l in irreps:
        Jl = _real_j_block(l)
        for _ in range(mul):
            for m in range(-l, l + 1):
                m_vals.append(m)
                partner.append(offset + (-m + l))
            j_blocks.append(Jl)
            offset += 2 * l + 1
    dim = offset

    # sincos layout matches prepare_sincos: [1, sin(a), cos(a), sin(2a), cos(2a), ...]
    sc_w = 1 + 2 * max_m
    cmap = np.zeros((dim, sc_w), np.float32)
    smap = np.zeros((dim, sc_w), np.float32)
    for i, m in enumerate(m_vals):
        if m == 0:
            cmap[i, 0] = 1.0
        else:
            cmap[i, 2 * abs(m)] = 1.0
            smap[i, 2 * abs(m) - 1] = 1.0 if m > 0 else -1.0

    perm = np.zeros((dim, dim), np.float32)
    for i, p in enumerate(partner):
        perm[p, i] = 1.0

    J = np.zeros((dim, dim), np.float32)
    off = 0
    for blk in j_blocks:
        n = blk.shape[0]
        J[off:off + n, off:off + n] = blk
        off += n

    # ---- lane packing: PK original rows per 128-lane super-row ---------------
    PK = max(1, LANE // dim) if dim <= LANE else 1
    packed_dim = PK * dim
    dim_pad = _round_up(packed_dim, LANE)

    # Block-diagonal repeats of J / perm per packed sub-row; identity padding
    # keeps padded lanes (which carry zeros end-to-end) at zero.
    perm_pad = np.eye(dim_pad, dtype=np.float32)
    J_pad = np.eye(dim_pad, dtype=np.float32)
    for k in range(PK):
        a, b = k * dim, (k + 1) * dim
        perm_pad[a:b, a:b] = perm
        J_pad[a:b, a:b] = J

    # Fold the m->-m permutation into J:  (c*v + s*(v@P)) @ J^T
    #   == concat([c*v, s*v], -1) @ [J^T ; -P@J^T]     (since s_{partner} = -s)
    mj = np.concatenate([J_pad.T, -(perm_pad @ J_pad.T)], axis=0)   # (2*dim_pad, dim_pad)

    # Packed (cos | sin) gather map: sub-row k's sincos drives lanes [k*dim,(k+1)*dim).
    csmapT = np.zeros((PK * sc_w, 2 * dim_pad), np.float32)
    for k in range(PK):
        r0, r1 = k * sc_w, (k + 1) * sc_w
        csmapT[r0:r1, k * dim:(k + 1) * dim] = cmap.T
        csmapT[r0:r1, dim_pad + k * dim:dim_pad + (k + 1) * dim] = smap.T

    return dict(
        max_m=max_m, dim=dim, sc_w=sc_w,
        pack=PK, packed_dim=packed_dim, dim_pad=dim_pad,
        # kernel constants (packed / padded / folded)
        csmapT=jnp.asarray(csmapT),
        mj=jnp.asarray(mj),
        perm_pad=jnp.asarray(perm_pad),
        # unpacked constants for the pure-JAX reference
        cmapT=jnp.asarray(np.ascontiguousarray(cmap.T)),
        smapT=jnp.asarray(np.ascontiguousarray(smap.T)),
        perm=jnp.asarray(perm),
        jT=jnp.asarray(np.ascontiguousarray(J.T)))


# ----------------------------------------------------------------------------
# Pallas kernel
# ----------------------------------------------------------------------------
def wigner_d_kernel(x_ref, scg_ref, scb_ref, sca_ref, csmap_ref, mj_ref, perm_ref,
                    o_ref, *, dim_pad):
    csmap = csmap_ref[...]          # (PK*sc_w, 2*dim_pad)
    mj = mj_ref[...]                # (2*dim_pad, dim_pad)   [J^T ; -P@J^T]
    v = x_ref[...]                  # (tile, dim_pad)

    def cs_of(sc):
        # per-angle (c, s) for every packed lane; 128-aligned lane slices.
        cs = jnp.dot(sc, csmap, preferred_element_type=jnp.float32)
        return cs[:, :dim_pad], cs[:, dim_pad:]

    # Dz(gamma) then J, and Dz(beta) then J: each one K=2*dim_pad MXU dot.
    for sc_ref in (scg_ref, scb_ref):
        c, s = cs_of(sc_ref[...])
        v = jnp.dot(jnp.concatenate([c * v, s * v], axis=-1), mj,
                    preferred_element_type=jnp.float32)

    # Final Dz(alpha): c*v + s*(v @ P)   (no trailing J, so no fold needed).
    c, s = cs_of(sca_ref[...])
    v = c * v + s * jnp.dot(v, perm_ref[...], preferred_element_type=jnp.float32)

    o_ref[...] = v.astype(o_ref.dtype)


def wigner_d_rotation(x, alpha, beta, gamma, info, *, tile_rows=512):
    """out = Dz(alpha) J Dz(beta) J Dz(gamma) x, applied row-wise via Pallas."""
    N, dim = x.shape
    assert dim == info["dim"]
    max_m, sc_w = info["max_m"], info["sc_w"]
    PK, packed_dim, dim_pad = info["pack"], info["packed_dim"], info["dim_pad"]

    n_super = -(-N // PK)                       # packed super-rows
    # Tile (in super-rows): large tiles for big N (85%+ of HBM roofline needs
    # 512+), but keep >=~4 grid steps so both v7x TensorCores get >=2 pipelined
    # steps each under dimension_semantics=("parallel",).
    tile = max(8, min(_round_up(tile_rows, 8), _round_up(max(n_super // 4, 1), 8)))
    n_super_pad = _round_up(n_super, tile)
    n_rows_pad = n_super_pad * PK

    # Pack rows: (N, dim) -> (n_super_pad, PK*dim) -> lane-pad to dim_pad.
    # The reshape is an unavoidable copy; the lane pad after packing is only
    # (dim_pad - packed_dim)/dim_pad (~9% at dim=13) of the bytes.
    x_p = jnp.pad(x.astype(jnp.float32), ((0, n_rows_pad - N), (0, 0)))
    x_p = jnp.pad(x_p.reshape(n_super_pad, packed_dim),
                  ((0, 0), (0, dim_pad - packed_dim)))

    def sincos_packed(angle):
        # prepare_sincos layout: [1, sin(a), cos(a), sin(2a), cos(2a), ...],
        # computed in plain XLA and packed PK-per-super-row (no lane padding:
        # the BlockSpec last dim equals the full array dim).
        a = jnp.pad(angle.reshape(-1).astype(jnp.float32), (0, n_rows_pad - N))
        ones = jnp.ones((n_rows_pad, 1), jnp.float32)
        if max_m == 0:
            sc = ones
        else:
            m = jnp.arange(1, max_m + 1, dtype=jnp.float32)
            ma = a[:, None] * m
            sc = jnp.concatenate(
                [ones,
                 jnp.stack([jnp.sin(ma), jnp.cos(ma)], axis=-1)
                    .reshape(n_rows_pad, 2 * max_m)], axis=-1)
        return sc.reshape(n_super_pad, PK * sc_w)

    sc_g = sincos_packed(gamma)
    sc_b = sincos_packed(beta)
    sc_a = sincos_packed(alpha)

    row_spec = pl.BlockSpec((tile, dim_pad), lambda i: (i, 0))
    sc_spec = pl.BlockSpec((tile, PK * sc_w), lambda i: (i, 0))

    def const_spec(shape):
        # Constant operands: full-array blocks with a fixed index_map, so the
        # pipeline only fetches them once.
        # TODO(synk): at dim_pad >= 512 on v7x add pipeline_mode=pl.Buffered(1)
        # to halve their VMEM footprint; irrelevant at dim_pad = 128.
        return pl.BlockSpec(shape, lambda i: (0, 0))

    out = pl.pallas_call(
        partial(wigner_d_kernel, dim_pad=dim_pad),
        out_shape=jax.ShapeDtypeStruct((n_super_pad, dim_pad), x.dtype),
        grid=(n_super_pad // tile,),
        in_specs=[row_spec, sc_spec, sc_spec, sc_spec,
                  const_spec((PK * sc_w, 2 * dim_pad)),
                  const_spec((2 * dim_pad, dim_pad)),
                  const_spec((dim_pad, dim_pad))],
        out_specs=row_spec,
        compiler_params=pltpu.CompilerParams(
            dimension_semantics=("parallel",)),
    )(x_p, sc_g, sc_b, sc_a, info["csmapT"], info["mj"], info["perm_pad"])

    # Unpack: drop lane pad, split super-rows back into original rows.
    return out[:, :packed_dim].reshape(n_rows_pad, dim)[:N]


# ----------------------------------------------------------------------------
# Pure-JAX reference (same math, unpacked, no Pallas) for validation
# ----------------------------------------------------------------------------
def ref_forward(x, alpha, beta, gamma, info):
    max_m = info["max_m"]

    def sincos(angle):
        a = angle.reshape(-1).astype(x.dtype)
        ones = jnp.ones((a.shape[0], 1), x.dtype)
        if max_m == 0:
            return ones
        m = jnp.arange(1, max_m + 1, dtype=x.dtype)
        ma = a[:, None] * m
        return jnp.concatenate(
            [ones,
             jnp.stack([jnp.sin(ma), jnp.cos(ma)], axis=-1)
                .reshape(a.shape[0], 2 * max_m)], axis=-1)

    def rot_z(v, sc):
        c = sc @ info["cmapT"]
        s = sc @ info["smapT"]
        return c * v + s * (v @ info["perm"])

    v = rot_z(x, sincos(gamma))
    v = v @ info["jT"]
    v = rot_z(v, sincos(beta))
    v = v @ info["jT"]
    return rot_z(v, sincos(alpha))


if __name__ == "__main__":
    # irreps: 2x l=0, 2x l=1, 1x l=2  ->  dim = 2*1 + 2*3 + 1*5 = 13
    irreps = [(2, 0), (2, 1), (1, 2)]
    info = build_wigner_d_info(irreps)
    dim = info["dim"]

    key = jax.random.PRNGKey(0)
    # N=512: multi-step grid with lane packing (pack=9 -> 57 super-rows, 4 steps);
    # N=37: packing remainder + single-step small-batch path.
    for N in (512, 37):
        kx, ka, kb, kg, key = jax.random.split(key, 5)
        x = jax.random.normal(kx, (N, dim), dtype=jnp.float32)
        alpha = jax.random.uniform(ka, (N,), minval=-math.pi, maxval=math.pi,
                                   dtype=jnp.float32)
        beta = jax.random.uniform(kb, (N,), minval=-math.pi, maxval=math.pi,
                                  dtype=jnp.float32)
        gamma = jax.random.uniform(kg, (N,), minval=-math.pi, maxval=math.pi,
                                   dtype=jnp.float32)

        out = jax.block_until_ready(wigner_d_rotation(x, alpha, beta, gamma, info))
        ref = ref_forward(x, alpha, beta, gamma, info)
        np.testing.assert_allclose(np.asarray(out), np.asarray(ref),
                                   rtol=1e-5, atol=1e-5)

        # the rotation is orthogonal per row -> norm preserved (extra sanity check)
        np.testing.assert_allclose(np.linalg.norm(np.asarray(out), axis=-1),
                                   np.linalg.norm(np.asarray(x), axis=-1),
                                   rtol=1e-4, atol=1e-4)

    print("KERNEL_OK")
</pallas_src>

<mosaic_0001>
module attributes {stable_mosaic.version = 11 : i64} {
  func.func @wigner_d_kernel(%arg0: i32, %arg1: memref<16x128xf32, #tpu.memory_space<vmem>>, %arg2: memref<16x45xf32, #tpu.memory_space<vmem>>, %arg3: memref<16x45xf32, #tpu.memory_space<vmem>>, %arg4: memref<16x45xf32, #tpu.memory_space<vmem>>, %arg5: memref<45x256xf32, #tpu.memory_space<vmem>>, %arg6: memref<256x128xf32, #tpu.memory_space<vmem>>, %arg7: memref<128x128xf32, #tpu.memory_space<vmem>>, %arg8: memref<16x128xf32, #tpu.memory_space<vmem>>) attributes {dimension_semantics = [#tpu.dimension_semantics<parallel>], iteration_bounds = array<i64: 4>, scalar_prefetch = 0 : i64, scratch_operands = 0 : i64, tpu.core_type = #tpu.core_type<tc>, window_params = [{transform_indices = @transform_0, window_bounds = array<i64: 16, 128>}, {transform_indices = @transform_1, window_bounds = array<i64: 16, 45>}, {transform_indices = @transform_2, window_bounds = array<i64: 16, 45>}, {transform_indices = @transform_3, window_bounds = array<i64: 16, 45>}, {pipeline_mode = #tpu.pipeline_mode<synchronous>, transform_indices = @transform_4, window_bounds = array<i64: 45, 256>}, {pipeline_mode = #tpu.pipeline_mode<synchronous>, transform_indices = @transform_5, window_bounds = array<i64: 256, 128>}, {pipeline_mode = #tpu.pipeline_mode<synchronous>, transform_indices = @transform_6, window_bounds = array<i64: 128, 128>}, {transform_indices = @transform_7, window_bounds = array<i64: 16, 128>}]} {
    %c0 = arith.constant 0 : index
    %c0_0 = arith.constant 0 : index
    %0 = vector.load %arg5[%c0, %c0_0] : memref<45x256xf32, #tpu.memory_space<vmem>>, vector<45x256xf32>
    %c0_1 = arith.constant 0 : index
    %c0_2 = arith.constant 0 : index
    %1 = vector.load %arg6[%c0_1, %c0_2] : memref<256x128xf32, #tpu.memory_space<vmem>>, vector<256x128xf32>
    %c0_3 = arith.constant 0 : index
    %c0_4 = arith.constant 0 : index
    %2 = vector.load %arg1[%c0_3, %c0_4] : memref<16x128xf32, #tpu.memory_space<vmem>>, vector<16x128xf32>
    %c0_5 = arith.constant 0 : index
    %c0_6 = arith.constant 0 : index
    %3 = vector.load %arg2[%c0_5, %c0_6] : memref<16x45xf32, #tpu.memory_space<vmem>>, vector<16x45xf32>
    %cst = arith.constant dense<0.000000e+00> : vector<16x256xf32>
    %4 = tpu.matmul %3, %0, %cst {dimension_numbers = #tpu.dot_dimension_numbers<[1], [0], [0], [1], [0, 0, 1, 1], [], []>} : vector<16x45xf32>, vector<45x256xf32>, vector<16x256xf32> -> vector<16x256xf32>
    %5 = vector.extract_strided_slice %4 {offsets = [0, 0], sizes = [16, 128], strides = [1, 1]} : vector<16x256xf32> to vector<16x128xf32>
    %6 = vector.extract_strided_slice %4 {offsets = [0, 128], sizes = [16, 128], strides = [1, 1]} : vector<16x256xf32> to vector<16x128xf32>
    %7 = arith.mulf %5, %2 : vector<16x128xf32>
    %8 = arith.mulf %6, %2 : vector<16x128xf32>
    %9 = tpu.concatenate %7, %8 in 1 : vector<16x128xf32>, vector<16x128xf32> -> vector<16x256xf32>
    %cst_7 = arith.constant dense<0.000000e+00> : vector<16x128xf32>
    %10 = tpu.matmul %9, %1, %cst_7 {dimension_numbers = #tpu.dot_dimension_numbers<[1], [0], [0], [1], [0, 0, 1, 1], [], []>} : vector<16x256xf32>, vector<256x128xf32>, vector<16x128xf32> -> vector<16x128xf32>
    %c0_8 = arith.constant 0 : index
    %c0_9 = arith.constant 0 : index
    %11 = vector.load %arg3[%c0_8, %c0_9] : memref<16x45xf32, #tpu.memory_space<vmem>>, vector<16x45xf32>
    %cst_10 = arith.constant dense<0.000000e+00> : vector<16x256xf32>
    %12 = tpu.matmul %11, %0, %cst_10 {dimension_numbers = #tpu.dot_dimension_numbers<[1], [0], [0], [1], [0, 0, 1, 1], [], []>} : vector<16x45xf32>, vector<45x256xf32>, vector<16x256xf32> -> vector<16x256xf32>
    %13 = vector.extract_strided_slice %12 {offsets = [0, 0], sizes = [16, 128], strides = [1, 1]} : vector<16x256xf32> to vector<16x128xf32>
    %14 = vector.extract_strided_slice %12 {offsets = [0, 128], sizes = [16, 128], strides = [1, 1]} : vector<16x256xf32> to vector<16x128xf32>
    %15 = arith.mulf %13, %10 : vector<16x128xf32>
    %16 = arith.mulf %14, %10 : vector<16x128xf32>
    %17 = tpu.concatenate %15, %16 in 1 : vector<16x128xf32>, vector<16x128xf32> -> vector<16x256xf32>
    %cst_11 = arith.constant dense<0.000000e+00> : vector<16x128xf32>
    %18 = tpu.matmul %17, %1, %cst_11 {dimension_numbers = #tpu.dot_dimension_numbers<[1], [0], [0], [1], [0, 0, 1, 1], [], []>} : vector<16x256xf32>, vector<256x128xf32>, vector<16x128xf32> -> vector<16x128xf32>
    %c0_12 = arith.constant 0 : index
    %c0_13 = arith.constant 0 : index
    %19 = vector.load %arg4[%c0_12, %c0_13] : memref<16x45xf32, #tpu.memory_space<vmem>>, vector<16x45xf32>
    %cst_14 = arith.constant dense<0.000000e+00> : vector<16x256xf32>
    %20 = tpu.matmul %19, %0, %cst_14 {dimension_numbers = #tpu.dot_dimension_numbers<[1], [0], [0], [1], [0, 0, 1, 1], [], []>} : vector<16x45xf32>, vector<45x256xf32>, vector<16x256xf32> -> vector<16x256xf32>
    %21 = vector.extract_strided_slice %20 {offsets = [0, 0], sizes = [16, 128], strides = [1, 1]} : vector<16x256xf32> to vector<16x128xf32>
    %22 = vector.extract_strided_slice %20 {offsets = [0, 128], sizes = [16, 128], strides = [1, 1]} : vector<16x256xf32> to vector<16x128xf32>
    %23 = arith.mulf %21, %18 : vector<16x128xf32>
    %c0_15 = arith.constant 0 : index
    %c0_16 = arith.constant 0 : index
    %24 = vector.load %arg7[%c0_15, %c0_16] : memref<128x128xf32, #tpu.memory_space<vmem>>, vector<128x128xf32>
    %cst_17 = arith.constant dense<0.000000e+00> : vector<16x128xf32>
    %25 = tpu.matmul %18, %24, %cst_17 {dimension_numbers = #tpu.dot_dimension_numbers<[1], [0], [0], [1], [0, 0, 1, 1], [], []>} : vector<16x128xf32>, vector<128x128xf32>, vector<16x128xf32> -> vector<16x128xf32>
    %26 = arith.mulf %22, %25 : vector<16x128xf32>
    %27 = arith.addf %23, %26 : vector<16x128xf32>
    %c0_18 = arith.constant 0 : index
    %c0_19 = arith.constant 0 : index
    %28 = vector.load %arg8[%c0_18, %c0_19] : memref<16x128xf32, #tpu.memory_space<vmem>>, vector<16x128xf32>
    tpu.vector_store %arg8[%c0_18, %c0_19], %27 {strides = array<i32>} : memref<16x128xf32, #tpu.memory_space<vmem>>, vector<16x128xf32>,
    return
  }
  func.func @transform_0(%arg0: i32) -> (i32, i32) {
    %c0_i32 = arith.constant 0 : i32
    %c0_i32_0 = arith.constant 0 : i32
    return %arg0, %c0_i32 : i32, i32
  }
  func.func @transform_1(%arg0: i32) -> (i32, i32) {
    %c0_i32 = arith.constant 0 : i32
    %c0_i32_0 = arith.constant 0 : i32
    return %arg0, %c0_i32 : i32, i32
  }
  func.func @transform_2(%arg0: i32) -> (i32, i32) {
    %c0_i32 = arith.constant 0 : i32
    %c0_i32_0 = arith.constant 0 : i32
    return %arg0, %c0_i32 : i32, i32
  }
  func.func @transform_3(%arg0: i32) -> (i32, i32) {
    %c0_i32 = arith.constant 0 : i32
    %c0_i32_0 = arith.constant 0 : i32
    return %arg0, %c0_i32 : i32, i32
  }
  func.func @transform_4(%arg0: i32) -> (i32, i32) {
    %c0_i32 = arith.constant 0 : i32
    %c0_i32_0 = arith.constant 0 : i32
    %c0_i32_1 = arith.constant 0 : i32
    return %c0_i32, %c0_i32_0 : i32, i32
  }
  func.func @transform_5(%arg0: i32) -> (i32, i32) {
    %c0_i32 = arith.constant 0 : i32
    %c0_i32_0 = arith.constant 0 : i32
    %c0_i32_1 = arith.constant 0 : i32
    return %c0_i32, %c0_i32_0 : i32, i32
  }
  func.func @transform_6(%arg0: i32) -> (i32, i32) {
    %c0_i32 = arith.constant 0 : i32
    %c0_i32_0 = arith.constant 0 : i32
    %c0_i32_1 = arith.constant 0 : i32
    return %c0_i32, %c0_i32_0 : i32, i32
  }
  func.func @transform_7(%arg0: i32) -> (i32, i32) {
    %c0_i32 = arith.constant 0 : i32
    %c0_i32_0 = arith.constant 0 : i32
    return %arg0, %c0_i32 : i32, i32
  }
}

</mosaic_0001>

<bundles_post_ra>
// kernel: tpu_custom_call.1
= control target key start
LH: loop header
LB: loop body
LE: loop exit
PB: predicated region body
PF: predicated region fallthrough
CT: control target
= control target key end

     0   :  { %12 = vsyncpa [#allocation3], 0  ;;  %s2057_s0 = inlined_call_operand.hbm [shape: f32[64,128], index: 0, kind: input, shape index: {}]   ;;  %s2058_s1 = inlined_call_operand.vmem [shape: f32[64,45], index: 1, kind: input, shape index: {}]   ;;  %s2059_s2 = inlined_call_operand.vmem [shape: f32[64,45], index: 2, kind: input, shape index: {}]   ;;  %s2060_s3 = inlined_call_operand.vmem [shape: f32[64,45], index: 3, kind: input, shape index: {}]   ;;  %s2061_s4 = inlined_call_operand.vmem [shape: f32[45,256], index: 4, kind: input, shape index: {}]   ;;  %s2062_s5 = inlined_call_operand.vmem [shape: f32[256,128], index: 5, kind: input, shape index: {}]   ;;  %s2063_s6 = inlined_call_operand.hbm [shape: f32[128,128], index: 6, kind: input, shape index: {}]   ;;  %s2064_s7 = inlined_call_operand.hbm [shape: f32[64,128], index: 7, kind: output, shape index: {}]  }
   0x1   :  { %14 = vsyncpa [#allocation3 + $0x1], 0 }
   0x2   :  { %15 = vsyncpa [#allocation6], 0 }
   0x3   :  { %16 = vsyncpa [#allocation4], 0 }
   0x4   :  { %18 = vsyncpa [#allocation4 + $0x1], 0  ;;  %s1624_s24 = smov 0   ;;  %s1626_s25 = smov 0  }
   0x5   :  { %s1628_s26 = smov 0   ;;  %s1630_s27 = smov 0  }
   0x6 LB: > { %s1645_s28 = sadd.s32 4294967295, %s1573_s27   ;;  %s1079_s29 = sadd.s32 4294967294, %s1573_s27   ;;  %s1573_s27 = sphi %s1630_s27, %s2090_s27   ;;  %s1569_s26 = sphi %s1628_s26, %s2089_s26   ;;  %s1565_s25 = sphi %s1626_s25, %s2088_s25   ;;  %s1561_s24 = sphi %s1624_s24, %s2087_s24  }
   0x7   : > { %p44_p0 = scmp.ne.s32.totalorder %s1565_s25, %s1561_s24  ;;  %p2065_p1 = scmp.eq.s32.totalorder %s1645_s28, 0 }
   0x8   : > { %p215_p3 = scmp.eq.s32.totalorder %s1079_s29, 3  ;;  %p1080_p5 = scmp.ge.s32.totalorder %s1573_s27, 1 }
   0x9   : > { %p1654_p4 = por %p2065_p1, %p44_p0  ;;  %p222_p7 = scmp.lt.s32.totalorder %s1573_s27, 5 }
   0xa   : > { %p1659_p6 = por %p215_p3, %p44_p0  ;;  %s1575_s10 = smov [#allocation5]  }
   0xb   : > { %s2070_s30 = scalar_select %p1654_p4, 1, 0 }
   0xc   : > { %s2071_s8 = scalar_select %p1659_p6, 1, 0 }
   0xd   : > { %p1664_p8 = pnand %p1080_p5, %p222_p7  ;;  %s240_s11 = sshll.u32 %s1575_s10, 4  ;;  %s241_s11 = int_to_ptr.vmem [resolvable:$true] %s240_s11 }
   0xe   : > { %s1677_s13 = sadd.s32 1, %s1573_s27   ;;  %s31_s14 = sadd.s32 1, %s1569_s26 }
   0xf   : > { %s2072_s9 = scalar_select %p1664_p8, 1, 0 }
  0x10   : > { %p1390_p9 = pneg %p1664_p8  ;;  %s28_s15 = ssub.s32 %s1573_s27, %s1677_s13 }
  0x11   : > { %s1445_s18 = scalar_lea.hbm %s2063_s6, 2048 }
  0x12   : > { %p1672_p10 = pnand %p1390_p9, %p2065_p1  ;;  %p1446_p11 = scmp.ne.s32.totalorder %s2063_s6, %s1445_s18 }
  0x13   : > { %p1452_p3 = scmp.lt.u32.totalorder %s1445_s18, %s2063_s6 }
  0x14   : > { %p1447_p12 = pneg %p1672_p10 }
  0x16   : > { %p1448_p13 = pnand %p1447_p12, %p1446_p11 }
  0x18   : > { %p1449_p0 = pneg %p1448_p13 }
  0x1a   : > { %p1454_p5 = pnand %p1452_p3, %p1449_p0 }
  0x1c   : > { %1457 = shalt.err (!%p1454_p5)
}
  0x1d   : > { %s1458_s23 = scalar_lea.vmem %s241_s11, 2048  ;;  %p1466_p2 = scmp.lt.s32.totalorder %s241_s11, %s241_s11 }
  0x1e   : > { %p1459_p7 = scmp.ne.s32.totalorder %s241_s11, %s1458_s23  ;;  %p1467_p6 = scmp.lt.s32.totalorder %s1458_s23, %s1458_s23 }
  0x20   : > { %p1461_p9 = pnand %p1459_p7, %p1447_p12  ;;  %p1468_p4 = por %p1467_p6, %p1466_p2 }
  0x22   : > { %p1462_p1 = pneg %p1461_p9 }
  0x24   : > { %p1469_p8 = pnand %p1468_p4, %p1462_p1 }
  0x26   : > { %1472 = shalt.err (!%p1469_p8)
}
  0x27   : > { %s2068_s29 = smov 128   ;;  %s1577_s10 = smov 8  }
  0x28   : > { %1393 = dma.hbm_to_vmem [thread:$0]  (!%p1672_p10), %s2063_s6, 2048, %s241_s11, [#allocation6], %s2068_s29, %s2068_s29, %s1577_s10  }
  0x29   : > { %p29_p1 = scmp.eq.s32.totalorder %s28_s15, 0  ;;  %p38_p2 = scmp.ne.s32.totalorder %s1569_s26, %s1565_s25 }
  0x2a   : > { %p39_p4 = scmp.eq.s32.totalorder %s1573_s27, 0  ;;  %p1403_p6 = scmp.lt.s32.totalorder %s1573_s27, 4 }
  0x2b   : > { %s1706_s18 = scalar_select %p29_p1, %s1569_s26, %s31_s14  }
  0x2c   : > { %p40_p8 = por %p39_p4, %p38_p2  ;;  %p2074_p11 = scmp.eq.s32.totalorder %s1645_s28, 3 }
  0x2d   : > { %s254_s12 = sand.u32 1, %s1569_s26   ;;  %s1113_s20 = sshll.u32 %s1573_s27, 8 }
  0x2e   : > { %p1710_p12 = por %p2074_p11, %p38_p2  ;;  %s1083_s21 = sshll.u32 %s254_s12, 4 }
  0x2f   : > { %s1719_s16 = scalar_lea.hbm %s2057_s0, %s1113_s20  ;;  %s258_s11 = scalar_lea.vmem [#allocation2], %s1083_s21 }
  0x30   : > { %s265_s14 = sshll.u32 %s258_s11, 4  ;;  %p1721_p10 = pnand %p1403_p6, %p40_p8  ;;  %s1725_s14 = int_to_ptr.vmem [resolvable:$true] %s265_s14 }
  0x31   : > { %s1727_s17 = scalar_lea.sflag [#allocation3], %s254_s12  ;;  %s1473_s29 = scalar_lea.hbm %s1719_s16, 256 }
  0x32   : > { %p1474_p13 = scmp.ne.s32.totalorder %s1719_s16, %s1473_s29  ;;  %p1475_p0 = pneg %p1721_p10 }
  0x33   : > { %s1478_s22 = scalar_lea.hbm %s2057_s0, 1024  ;;  %p1479_p7 = scmp.lt.u32.totalorder %s1719_s16, %s2057_s0 }
  0x34   : > { %p1476_p3 = pnand %p1475_p0, %p1474_p13  ;;  %p1480_p9 = scmp.lt.u32.totalorder %s1478_s22, %s1473_s29 }
  0x35   : > { %p1482_p2 = scmp.lt.u32.totalorder %s1473_s29, %s1719_s16 }
  0x36   : > { %p1477_p5 = pneg %p1476_p3  ;;  %p1481_p1 = por %p1480_p9, %p1479_p7 }
  0x38   : > { %p1483_p4 = por %p1482_p2, %p1481_p1 }
  0x3a   : > { %p1484_p6 = pnand %p1483_p4, %p1477_p5 }
  0x3c   : > { %1487 = shalt.err (!%p1484_p6)
}
  0x3d   : > { %s1488_s12 = scalar_lea.vmem %s1725_s14, 256  ;;  %s1578_s20 = smov [#allocation2]  }
  0x3e   : > { %p1489_p8 = scmp.ne.s32.totalorder %s1725_s14, %s1488_s12  ;;  %s1493_s21 = sshll.u32 %s1578_s20, 4  ;;  %s1494_s21 = int_to_ptr.vmem [resolvable:$false] %s1493_s21 }
  0x3f   : > { %s1495_s23 = scalar_lea.vmem %s1494_s21, 512  ;;  %p1496_p3 = scmp.lt.s32.totalorder %s1725_s14, %s1494_s21 }
  0x40   : > { %p1491_p11 = pnand %p1489_p8, %p1475_p0  ;;  %p1497_p7 = scmp.lt.s32.totalorder %s1495_s23, %s1488_s12 }
  0x42   : > { %p1492_p13 = pneg %p1491_p11  ;;  %p1498_p9 = por %p1497_p7, %p1496_p3 }
  0x44   : > { %p1499_p1 = pnand %p1498_p9, %p1492_p13 }
  0x46   : > { %1502 = shalt.err (!%p1499_p1)
}
  0x47   : > { %s2077_s29 = smov 128   ;;  %p2078_p0 = scmp.ne.s32.totalorder %s2072_s9, 0 }
  0x48   : > { %1397 = dma.hbm_to_vmem [thread:$0]  (!%p1721_p10), %s1719_s16, 256, %s1725_s14, %s1727_s17, %s2077_s29, %s2077_s29, %s1577_s10  }
  0x49   : > { %304 = sbr.rel (%p2078_p0) target bundleno = 984 (0x3d8), region = 48  ;;  %s1761_s22 = sand.u32 (!%p2078_p0), 1, %s1565_s25  }
  0x4a   : > { %s2069_s11 = sshll.u32 (!%p2078_p0), %s1761_s22, 4  ;;  %s307_s12 = scalar_lea.sflag (!%p2078_p0), [#allocation3], %s1761_s22 }
  0x4b   : > { %s1767_s15 = scalar_lea.vmem (!%p2078_p0), [#allocation2], %s2069_s11  ;;  %p2079_p5 = scmp.ne.s32.totalorder (!%p2078_p0), %s2070_s30, 0 }
  0x50   : > { %1548 = dma.done.wait (%p2079_p5), %s307_s12, 256  }
  0x51   : > { %1550 = vsyncadd (%p2079_p5), %s307_s12, 4294967040  ;;  %p2080_p10 = scmp.eq.s32.totalorder %s1645_s28, 0 }
  0x53   : > { %1552 = dma.done.wait (%p2080_p10), [#allocation6], 2048   ;;  %p2081_p2 = pmov %p2080_p10 }
  0x54   : > { %v1579_v0 = vmov 0.0   ;;  %s1090_s9 = sshll.u32 %s1645_s28, 1  ;;  %v381_v1 = vld [vmem:[%s2061_s4 + $0x8] sm:$0xff]  ;;  %v383_v2 = vld [vmem:[%s2061_s4 + $0x18] sm:$0xff]  ;;  %v380_v3 = vld [vmem:[%s2061_s4] sm:$0xff]  ;;  %vm435_vm0 = vcmask 1044480  }
  0x55   : > { %1554 = vsyncadd (%p2081_p2), [#allocation6], 4294965248  ;;  %506 = vmatprep.mubr.f32.mxu0 %v1579_v0  ;;  %p1779_p4 = scmp.lt.s32.totalorder %s1090_s9, 7  ;;  %v1792_v4 = vpack.c.bf16 %v383_v2, %v381_v1  ;;  %v382_v5 = vld [vmem:[%s2061_s4 + $0x10] sm:$0xff]  ;;  %v385_v6 = vld [vmem:[%s2061_s4 + $0x28] sm:$0xff]  ;;  %vm1580_vm1 = vmmov 1  }
  0x56   : > { %v387_v7 = vld [vmem:[%s2061_s4 + $0x38] sm:$0xff]  ;;  %v1803_v8 = vpack.c.bf16 %v382_v5, %v380_v3  ;;  %v384_v10 = vld [vmem:[%s2061_s4 + $0x20] sm:$0xff]  ;;  %v386_v11 = vld [vmem:[%s2061_s4 + $0x30] sm:$0xff]  ;;  %vm428_vm3 = vcmask 367616   ;;  %s1114_s30 = sshll.u32 %s1645_s28, 8  ;;  %s947_s23 = scalar_lea.sflag [#allocation4], %s1761_s22 }
  0x57   : > { %v1805_v9 = vpack.c.bf16 %v387_v7, %v385_v6  ;;  %v389_v12 = vld [vmem:[%s2061_s4 + $0x48] sm:$0xff]  ;;  %s2092_s9 = smov (!%p1779_p4, %s1090_s9), 7  ;;  %1245 = vmatprep.subr.bf16.mxu0 %v1792_v4  ;;  %v391_v13 = vld [vmem:[%s2061_s4 + $0x58] sm:$0x1f]  ;;  %vm1822_vm2 = vmpackc.low %vm435_vm0, %vm1580_vm1  ;;  %v1827_v15 = vpack.c.bf16 %v386_v11, %v384_v10  ;;  %s1581_s28 = smov [#allocation7]  }
  0x58   : > { %1247 = vmatpush1.bf16.msra.mxu0 %v1803_v8  ;;  %v388_v16 = vld [vmem:[%s2061_s4 + $0x40] sm:$0xff]  ;;  %v390_v17 = vld [vmem:[%s2061_s4 + $0x50] sm:$0x1f]  ;;  %v1839_v19 = vpack.c.bf16 %v391_v13, %v389_v12  ;;  %v409_v20 = vld [vmem:[%s2062_s5 + $0x88] sm:$0xff]  ;;  %s1850_s14 = sshll.u32 %s2092_s9, 3 }
  0x59   : > { %v408_v18 = vld [vmem:[%s2062_s5 + $0x80] sm:$0xff]  ;;  %1249 = vmatprep.subr.bf16.mxu0 %v1805_v9  ;;  %v393_v22 = vld [vmem:[%s2062_s5 + $0x8] sm:$0xff]  ;;  %v410_v25 = vld [vmem:[%s2062_s5 + $0x90] sm:$0xff]  ;;  %v1875_v32 = vpack.c.bf16 %v390_v17, %v388_v16  ;;  %s365_s20 = scalar_lea.vmem %s2058_s1, %s1850_s14  ;;  %s371_s29 = scalar_lea.vmem %s2059_s2, %s1850_s14 }
  0x5a   : > { %v392_v21 = vld [vmem:[%s2062_s5] sm:$0xff]  ;;  %v1258_v23 = vpack.c.bf16 %v409_v20, %v408_v18  ;;  %v411_v26 = vld [vmem:[%s2062_s5 + $0x98] sm:$0xff]  ;;  %v394_v27 = vld [vmem:[%s2062_s5 + $0x10] sm:$0xff]  ;;  %s377_s12 = scalar_lea.vmem %s2060_s3, %s1850_s14  ;;  %s2085_s14 = sshll.u32 %s1761_s22, 4 }
  0x5b   : > { %v1852_v24 = vpack.c.bf16 %v393_v22, %v392_v21  ;;  %v1863_v28 = vpack.c.bf16 %v411_v26, %v410_v25  ;;  %v395_v29 = vld [vmem:[%s2062_s5 + $0x18] sm:$0xff]  ;;  %v412_v30 = vld [vmem:[%s2062_s5 + $0xa0] sm:$0xff]  ;;  %v413_v31 = vld [vmem:[%s2062_s5 + $0xa8] sm:$0xff]  ;;  %s359_s16 = scalar_lea.vmem [#allocation7], %s2085_s14 }
  0x5c   : > { %1251 = vmatpush1.bf16.msra.mxu0 %v1827_v15  ;;  %1259 = vmatprep.subr.bf16.mxu1 %v1258_v23  ;;  %v1885_v33 = vpack.c.bf16 %v395_v29, %v394_v27  ;;  %v1888_v34 = vpack.c.bf16 %v413_v31, %v412_v30  ;;  %v396_v35 = vld [vmem:[%s2062_s5 + $0x20] sm:$0xff]  ;;  %v397_v36 = vld [vmem:[%s2062_s5 + $0x28] sm:$0xff]  ;;  %v414_v37 = vld [vmem:[%s2062_s5 + $0xb0] sm:$0xff]  ;;  %s960_s10 = sshll.u32 %s359_s16, 4  ;;  %s2009_s10 = int_to_ptr.vmem [resolvable:$true] %s960_s10 }
  0x5d   : > { %1254 = vmatprep.subr.msk.bf16.mxu0 %vm1822_vm2, %v1839_v19  ;;  %1261 = vmatpush3.bf16.msra.mxu1 %v1852_v24  ;;  %v415_v38 = vld [vmem:[%s2062_s5 + $0xb8] sm:$0xff]  ;;  %v426_v39 = vld [vmem:[%s365_s20] sm:$0xff]  ;;  %v1268_v40 = vpack.c.bf16 %v397_v36, %v396_v35  ;;  %v398_v42 = vld [vmem:[%s2062_s5 + $0x30] sm:$0xff]  ;;  %s1503_s9 = scalar_lea.vmem %s2009_s10, 256 }
  0x5e   : > { %1263 = vmatprep.subr.bf16.mxu1 %v1863_v28  ;;  %v1270_v41 = vpack.c.bf16 %v415_v38, %v414_v37  ;;  %v399_v43 = vld [vmem:[%s2062_s5 + $0x38] sm:$0xff]  ;;  %v416_v44 = vld [vmem:[%s2062_s5 + $0xc0] sm:$0xff]  ;;  %v417_v45 = vld [vmem:[%s2062_s5 + $0xc8] sm:$0xff]  ;;  %p1504_p6 = scmp.ne.s32.totalorder %s2009_s10, %s1503_s9 }
  0x5f   : > { %v427_v46 = vld [vmem:[%s365_s20 + $0x8] sm:$0xff]  ;;  %v1272_v47 = vpack.c.bf16 %v399_v43, %v398_v42  ;;  %v1274_v48 = vpack.c.bf16 %v417_v45, %v416_v44  ;;  %v400_v49 = vld [vmem:[%s2062_s5 + $0x40] sm:$0xff]  ;;  %v418_v51 = vld [vmem:[%s2062_s5 + $0xd0] sm:$0xff]  ;;  %s2014_s20 = scalar_lea.hbm %s2064_s7, %s1114_s30 }
  0x60   : > { %1257 = vmatpush1.bf16.msk.msra.mxu0 %vm1822_vm2, %v1875_v32  ;;  %v401_v50 = vld [vmem:[%s2062_s5 + $0x48] sm:$0xff]  ;;  %v419_v52 = vld [vmem:[%s2062_s5 + $0xd8] sm:$0xff]  ;;  %v402_v55 = vld [vmem:[%s2062_s5 + $0x50] sm:$0xff]  ;;  %p1505_p8 = pnand %p1504_p6, %p1710_p12 }
  0x61   : > { %1265 = vmatpush3.bf16.msra.mxu1 %v1885_v33  ;;  %1291 = vmatprep.subr.bf16.mxu0 %v1792_v4  ;;  %v1276_v53 = vpack.c.bf16 %v401_v50, %v400_v49  ;;  %v1278_v54 = vpack.c.bf16 %v419_v52, %v418_v51  ;;  %v403_v56 = vld [vmem:[%s2062_s5 + $0x58] sm:$0xff]  ;;  %v420_v57 = vld [vmem:[%s2062_s5 + $0xe0] sm:$0xff]  ;;  %v421_v58 = vld [vmem:[%s2062_s5 + $0xe8] sm:$0xff] }
  0x62   : > { %1267 = vmatprep.subr.bf16.mxu1 %v1888_v34  ;;  %v1280_v59 = vpack.c.bf16 %v403_v56, %v402_v55  ;;  %v1282_v60 = vpack.c.bf16 %v421_v58, %v420_v57  ;;  %v404_v61 = vld [vmem:[%s2062_s5 + $0x60] sm:$0xff]  ;;  %v405_v62 = vld [vmem:[%s2062_s5 + $0x68] sm:$0xff]  ;;  %v422_v1 = vld [vmem:[%s2062_s5 + $0xf0] sm:$0xff]  ;;  %p1506_p11 = pneg %p1505_p8 }
  0x63   : > { %1098 = vmatmul.mubr.msk.f32.vlgmr.msra.gmra.mrb[0].mxu0 %vm428_vm3, %v426_v39  ;;  %v1284_v63 = vpack.c.bf16 %v405_v62, %v404_v61  ;;  %v423_v2 = vld [vmem:[%s2062_s5 + $0xf8] sm:$0xff]  ;;  %v406_v5 = vld [vmem:[%s2062_s5 + $0x70] sm:$0xff]  ;;  %v598_v10 = vld [vmem:[%s371_s29] sm:$0xff] }
  0x64   : > { %512 = vmatprep.mubr.f32.mxu0 %v1579_v0  ;;  %1293 = vmatpush1.bf16.msra.mxu0 %v1803_v8  ;;  %v1286_v3 = vpack.c.bf16 %v423_v2, %v422_v1  ;;  %v407_v6 = vld [vmem:[%s2062_s5 + $0x78] sm:$0xff]  ;;  %v599_v11 = vld [vmem:[%s371_s29 + $0x8] sm:$0xff]  ;;  %v424_v12 = vld [vmem:[%s1767_s15] sm:$0xff]  ;;  %s1507_s29 = sshll.u32 %s1581_s28, 4  ;;  %s1508_s29 = int_to_ptr.vmem [resolvable:$false] %s1507_s29 }
  0x65   : > { %1269 = vmatpush3.bf16.msra.mxu1 %v1268_v40  ;;  %1295 = vmatprep.subr.bf16.mxu0 %v1805_v9  ;;  %v1288_v7 = vpack.c.bf16 %v407_v6, %v406_v5  ;;  %v425_v20 = vld [vmem:[%s1767_s15 + $0x8] sm:$0xff]  ;;  %v849_v29 = vld [vmem:[#allocation5] sm:$0xff]  ;;  %v851_v30 = vld [vmem:[#allocation5 + $0x10] sm:$0xff]  ;;  %s1509_s15 = scalar_lea.vmem %s1508_s29, 512  ;;  %p1510_p13 = scmp.lt.s32.totalorder %s2009_s10, %s1508_s29 }
  0x66   : > { %1271 = vmatprep.subr.bf16.mxu1 %v1270_v41  ;;  %v853_v35 = vld [vmem:[#allocation5 + $0x20] sm:$0xff]  ;;  %v854_v36 = vld [vmem:[#allocation5 + $0x28] sm:$0xff]  ;;  %v855_v38 = vld [vmem:[#allocation5 + $0x30] sm:$0xff]  ;;  %p1511_p3 = scmp.lt.s32.totalorder %s1509_s15, %s1503_s9 }
  0x67   : > { %1099 = vmatmul.mubr.msk.f32.gmra.mrb[2].mxu0 %vm428_vm3, %v427_v46  ;;  %v1358_v37 = vpack.c.bf16 %v854_v36, %v853_v35  ;;  %v856_v39 = vld [vmem:[#allocation5 + $0x38] sm:$0xff]  ;;  %v858_v42 = vld [vmem:[#allocation5 + $0x48] sm:$0xff]  ;;  %v859_v44 = vld [vmem:[#allocation5 + $0x50] sm:$0xff] }
  0x68   : > { %1297 = vmatpush1.bf16.msra.mxu0 %v1827_v15  ;;  %670 = vmatprep.mubr.f32.mxu0 %v1579_v0  ;;  %v860_v45 = vld [vmem:[#allocation5 + $0x58] sm:$0xff]  ;;  %v862_v57 = vld [vmem:[#allocation5 + $0x68] sm:$0xff]  ;;  %p1512_p7 = por %p1511_p3, %p1510_p13 }
  0x69   : > { %1273 = vmatpush3.bf16.msra.mxu1 %v1272_v47  ;;  %1300 = vmatprep.subr.msk.bf16.mxu0 %vm1822_vm2, %v1839_v19  ;;  %v1370_v46 = vpack.c.bf16 %v860_v45, %v859_v44 }
  0x6a   : > { %1275 = vmatprep.subr.bf16.mxu1 %v1274_v48  ;;  %p1513_p9 = pnand %p1512_p7, %p1506_p11 }
  0x6c   : > { %1303 = vmatpush1.bf16.msk.msra.mxu0 %vm1822_vm2, %v1875_v32 }
  0x6d   : > { %1277 = vmatpush3.bf16.msra.mxu1 %v1276_v53  ;;  %1305 = vmatprep.subr.bf16.mxu0 %v1258_v23 }
  0x6e   : > { %1279 = vmatprep.subr.bf16.mxu1 %v1278_v54 }
  0x6f   : > { %1102 = vmatmul.mubr.msk.f32.vlgmr.msra.gmra.mrb[4].mxu0 %vm428_vm3, %v598_v10 }
  0x70   : > { %676 = vmatprep.mubr.f32.mxu0 %v1579_v0  ;;  %1307 = vmatpush3.bf16.msra.mxu0 %v1852_v24 }
  0x71   : > { %1281 = vmatpush3.bf16.msra.mxu1 %v1280_v59  ;;  %1309 = vmatprep.subr.bf16.mxu0 %v1863_v28 }
  0x72   : > { %1283 = vmatprep.subr.bf16.mxu1 %v1282_v60 }
  0x73   : > { %1103 = vmatmul.mubr.msk.f32.gmra.mrb[6].mxu0 %vm428_vm3, %v599_v11 }
  0x74   : > { %1311 = vmatpush3.bf16.msra.mxu0 %v1885_v33  ;;  %v852_v33 = vld [vmem:[#allocation5 + $0x18] sm:$0xff] }
  0x75   : > { %1285 = vmatpush3.bf16.msra.mxu1 %v1284_v63  ;;  %1313 = vmatprep.subr.bf16.mxu0 %v1888_v34  ;;  %v1354_v34 = vpack.c.bf16 %v852_v33, %v851_v30 }
  0x76   : > { %1287 = vmatprep.subr.bf16.mxu1 %v1286_v3 }
  0x78   : > { %1315 = vmatpush3.bf16.msra.mxu0 %v1268_v40  ;;  %v1362_v40 = vpack.c.bf16 %v856_v39, %v855_v38 }
  0x79   : > { %1289 = vmatpush3.bf16.msra.mxu1 %v1288_v7  ;;  %1317 = vmatprep.subr.bf16.mxu0 %v1270_v41  ;;  %v857_v41 = vld [vmem:[#allocation5 + $0x40] sm:$0xff] }
  0x7a   : > { %v1366_v43 = vpack.c.bf16 %v858_v42, %v857_v41 }
  0x7c   : > { %1319 = vmatpush3.bf16.msra.mxu0 %v1272_v47 }
  0x7d   : > { %1321 = vmatprep.subr.bf16.mxu0 %v1274_v48 }
  0x80   : > { %1323 = vmatpush3.bf16.msra.mxu0 %v1276_v53 }
  0x81   : > { %1325 = vmatprep.subr.bf16.mxu0 %v1278_v54 }
  0x84   : > { %1327 = vmatpush3.bf16.msra.mxu0 %v1280_v59  ;;  %v863_v59 = vld [vmem:[#allocation5 + $0x70] sm:$0xff] }
  0x85   : > { %1329 = vmatprep.subr.bf16.mxu0 %v1282_v60  ;;  %v864_v60 = vld [vmem:[#allocation5 + $0x78] sm:$0xff] }
  0x88   : > { %1331 = vmatpush3.bf16.msra.mxu0 %v1284_v63 }
  0x89   : > { %1333 = vmatprep.subr.bf16.mxu0 %v1286_v3 }
  0x8c   : > { %1335 = vmatpush3.bf16.msra.mxu0 %v1288_v7 }
  0x8d   : > { %1337 = vmatprep.subr.bf16.mxu0 %v1792_v4  ;;  %v850_v4 = vld [vmem:[#allocation5 + $0x8] sm:$0xff] }
  0x8e   : > { %v1350_v31 = vpack.c.bf16 %v850_v4, %v849_v29 }
  0x90   : > { %1351 = vmatprep.subr.bf16.mxu1 %v1350_v31 }
 0x136   : > { %v508_v13 = vpop.f32.mrb[0].mxu0 }
 0x137   : > { %v510_v16 = vpop.f32.mrb[1].mxu0  ;;  %v519_v18 = vmul.f32 %v508_v13, %v424_v12 }
 0x138   : > { %v521_v17 = vmul.f32 %v510_v16, %v424_v12 }
 0x13a   : > { %v514_v21 = vpop.f32.mrb[2].mxu0  ;;  %587 = vmatprep.mubr.f32.mxu1 %v521_v17 }
 0x13b   : > { %v516_v22 = vpop.f32.mrb[3].mxu0  ;;  %588 = vmatmul.mubr.f32.vlgmr.msra.gmra.mrb[0].mxu1 %v519_v18  ;;  %v520_v24 = vmul.f32 %v514_v21, %v425_v20 }
 0x13c   : > { %v522_v23 = vmul.f32 %v516_v22, %v425_v20  ;;  %1353 = vmatpush3.bf16.msra.mxu1 %v1350_v31 }
 0x13d   : > { %1355 = vmatprep.subr.bf16.mxu1 %v1354_v34 }
 0x13e   : > { %592 = vmatprep.mubr.f32.mxu1 %v522_v23 }
 0x13f   : > { %593 = vmatmul.mubr.f32.gmra.mrb[2].mxu1 %v520_v24 }
 0x140   : > { %1357 = vmatpush3.bf16.msra.mxu1 %v1354_v34 }
 0x141   : > { %1359 = vmatprep.subr.bf16.mxu1 %v1358_v37 }
 0x142   : > { %v672_v25 = vpop.f32.mrb[4].mxu0 }
 0x143   : > { %v674_v26 = vpop.f32.mrb[5].mxu0 }
 0x144   : > { %1361 = vmatpush3.bf16.msra.mxu1 %v1358_v37 }
 0x145   : > { %1363 = vmatprep.subr.bf16.mxu1 %v1362_v40 }
 0x146   : > { %v678_v27 = vpop.f32.mrb[6].mxu0 }
 0x147   : > { %v680_v28 = vpop.f32.mrb[7].mxu0 }
 0x148   : > { %1365 = vmatpush3.bf16.msra.mxu1 %v1362_v40 }
 0x149   : > { %1367 = vmatprep.subr.bf16.mxu1 %v1366_v43 }
 0x14c   : > { %1369 = vmatpush3.bf16.msra.mxu1 %v1366_v43 }
 0x14d   : > { %1371 = vmatprep.subr.bf16.mxu1 %v1370_v46 }
 0x150   : > { %1373 = vmatpush3.bf16.msra.mxu1 %v1370_v46 }
 0x20e   : > { %v1147_v47 = vpop.f32.mrb[0].mxu1 }
 0x20f   : > { %v1148_v48 = vpop.f32.mrb[1].mxu1 }
 0x210   : > { %v1149_v49 = vadd.f32 %v1148_v48, %v1147_v47 }
 0x212   : > { %v683_v50 = vmul.f32 %v1149_v49, %v672_v25  ;;  %v685_v51 = vmul.f32 %v1149_v49, %v674_v26  ;;  %v1150_v52 = vpop.f32.mrb[2].mxu1 }
 0x213   : > { %v1151_v53 = vpop.f32.mrb[3].mxu1 }
 0x214   : > { %v1152_v54 = vadd.f32 %v1151_v53, %v1150_v52  ;;  %751 = vmatprep.mubr.f32.mxu0 %v685_v51 }
 0x215   : > { %752 = vmatmul.mubr.f32.vlgmr.msra.gmra.mrb[8].mxu0 %v683_v50 }
 0x216   : > { %v684_v55 = vmul.f32 %v1152_v54, %v678_v27  ;;  %v686_v56 = vmul.f32 %v1152_v54, %v680_v28  ;;  %1339 = vmatpush1.bf16.msra.mxu0 %v1803_v8  ;;  %v762_v8 = vld [vmem:[%s377_s12] sm:$0xff] }
 0x217   : > { %1341 = vmatprep.subr.bf16.mxu0 %v1805_v9  ;;  %v763_v9 = vld [vmem:[%s377_s12 + $0x8] sm:$0xff] }
 0x218   : > { %756 = vmatprep.mubr.f32.mxu0 %v686_v56 }
 0x219   : > { %757 = vmatmul.mubr.f32.gmra.mrb[10].mxu0 %v684_v55 }
 0x21a   : > { %1343 = vmatpush1.bf16.msra.mxu0 %v1827_v15  ;;  %834 = vmatprep.mubr.f32.mxu0 %v1579_v0  ;;  %v861_v15 = vld [vmem:[#allocation5 + $0x60] sm:$0xff] }
 0x21b   : > { %1346 = vmatprep.subr.msk.bf16.mxu0 %vm1822_vm2, %v1839_v19  ;;  %v1374_v58 = vpack.c.bf16 %v862_v57, %v861_v15  ;;  %v1378_v19 = vpack.c.bf16 %v864_v60, %v863_v59 }
 0x21d   : > { %1375 = vmatprep.subr.bf16.mxu1 %v1374_v58 }
 0x21e   : > { %1349 = vmatpush1.bf16.msk.msra.mxu0 %vm1822_vm2, %v1875_v32  ;;  %1377 = vmatpush3.bf16.msra.mxu1 %v1374_v58 }
 0x21f   : > { %1379 = vmatprep.subr.bf16.mxu1 %v1378_v19 }
 0x221   : > { %1106 = vmatmul.mubr.msk.f32.vlgmr.msra.gmra.mrb[12].mxu0 %vm428_vm3, %v762_v8 }
 0x222   : > { %840 = vmatprep.mubr.f32.mxu0 %v1579_v0  ;;  %1381 = vmatpush3.bf16.msra.mxu1 %v1378_v19 }
 0x225   : > { %1107 = vmatmul.mubr.msk.f32.gmra.mrb[14].mxu0 %vm428_vm3, %v763_v9 }
 0x2e8   : > { %v1185_v14 = vpop.f32.mrb[8].mxu0 }
 0x2e9   : > { %v1186_v32 = vpop.f32.mrb[9].mxu0 }
 0x2ea   : > { %v1187_v61 = vadd.f32 %v1186_v32, %v1185_v14 }
 0x2ec   : > { %v1188_v62 = vpop.f32.mrb[10].mxu0  ;;  %1241 = vmatprep.mubr.f32.mxu1 %v1187_v61 }
 0x2ed   : > { %v1189_v0 = vpop.f32.mrb[11].mxu0 }
 0x2ee   : > { %v1190_v63 = vadd.f32 %v1189_v0, %v1188_v62 }
 0x2f0   : > { %1242 = vmatmul.mubr.f32.vlgmr.msra.gmra.mrb[4].mxu1 %v1190_v63 }
 0x2f4   : > { %v836_v1 = vpop.f32.mrb[12].mxu0 }
 0x2f5   : > { %v847_v2 = vmul.f32 %v1187_v61, %v836_v1  ;;  %v838_v3 = vpop.f32.mrb[13].mxu0 }
 0x2f8   : > { %v842_v5 = vpop.f32.mrb[14].mxu0 }
 0x2f9   : > { %v848_v6 = vmul.f32 %v1190_v63, %v842_v5  ;;  %v844_v7 = vpop.f32.mrb[15].mxu0 }
 0x3c3   : > { %v1243_v10 = vpop.f32.mrb[4].mxu1 }
 0x3c4   : > { %v941_v11 = vmul.f32 %v1243_v10, %v844_v7  ;;  %v931_v12 = vpop.f32.mrb[5].mxu1 }
 0x3c5   : > { %v940_v13 = vmul.f32 %v931_v12, %v838_v3 }
 0x3c6   : > { %v943_v16 = vadd.f32 %v941_v11, %v848_v6 }
 0x3c7   : > { %v942_v17 = vadd.f32 %v940_v13, %v847_v2 }
 0x3c8   : > { %945 = vst [vmem:[%s359_s16 + $0x8] sm:$0xff] %v943_v16 }
 0x3c9   : > { %944 = vst [vmem:[%s359_s16] sm:$0xff] %v942_v17 }
 0x3ca   : > { %1516 = shalt.err (!%p1513_p9)
}
 0x3cb   : > { %s1517_s11 = scalar_lea.hbm %s2014_s20, 256  ;;  %s1521_s16 = scalar_lea.hbm %s2064_s7, 1024 }
 0x3cc   : > { %p1518_p1 = scmp.ne.s32.totalorder %s2014_s20, %s1517_s11  ;;  %p1522_p10 = scmp.lt.u32.totalorder %s2014_s20, %s2064_s7 }
 0x3cd   : > { %p1523_p2 = scmp.lt.u32.totalorder %s1521_s16, %s1517_s11  ;;  %p1525_p6 = scmp.lt.u32.totalorder %s1517_s11, %s2014_s20 }
 0x3ce   : > { %p1519_p0 = pnand %p1518_p1, %p1710_p12 }
 0x3cf   : > { %p1524_p4 = por %p1523_p2, %p1522_p10 }
 0x3d0   : > { %p1520_p5 = pneg %p1519_p0 }
 0x3d1   : > { %p1526_p8 = por %p1525_p6, %p1524_p4 }
 0x3d3   : > { %p1527_p11 = pnand %p1526_p8, %p1520_p5 }
 0x3d5   : > { %1530 = shalt.err (!%p1527_p11)
}
 0x3d6   : > { %s1582_s21 = smov 128   ;;  %s1583_s9 = smov 8  }
 0x3d7   : > { %1388 = dma.vmem_to_hbm [thread:$0]  (%p1710_p12), %s2009_s10, 256, %s2014_s20, %s947_s23, %s1582_s21, %s1582_s21, %s1583_s9  }
 0x3d8 PF: > { %p1405_p13 = scmp.ge.s32.totalorder %s1573_s27, 2  ;;  %s975_s28 = sand.u32 1, %s1561_s24  }
 0x3d9   : > { %p2086_p3 = scmp.ne.s32.totalorder %s2071_s8, 0  ;;  %s976_s29 = scalar_lea.sflag [#allocation4], %s975_s28 }
 0x3db   : > { %p1399_p7 = pnand %p1405_p13, %p2086_p3 }
 0x3dd   : > { %1556 = dma.done.wait (!%p1399_p7), %s976_s29, 256  }
 0x3de   : > { %1558 = vsyncadd (!%p1399_p7), %s976_s29, 4294967040  ;;  %p21_p9 = scmp.ge.s32.totalorder %s1677_s13, 6   ;;  %s2087_s24 = smov %s1565_s25 }
 0x3df   : > { %s2088_s25 = smov %s1569_s26  ;;  %s2089_s26 = smov %s1706_s18 }
 0x3e0   : > { %s2090_s27 = smov %s1677_s13  ;;  %23 = sbr.rel (!%p21_p9) target bundleno = 6 (0x6), region = 106 }
 0x3e7   :  { %981 = vsyncpa [#allocation3], 1 }
 0x3e8   :  { %983 = vsyncpa [#allocation3 + $0x1], 1 }
 0x3e9   :  { %984 = vsyncpa [#allocation6], 1 }
 0x3ea   :  { %985 = vsyncpa [#allocation4], 1 }
 0x3eb   :  { %987 = vsyncpa [#allocation4 + $0x1], 1 }

</bundles_post_ra>
